<compile_context>
chip_gen: v5e
topology: v5e:2x2
jax: 0.10.0
libtpu: 0.0.40
codegen_flags: <defaults>
</compile_context>

<pallas_src>
import jax
import jax.numpy as jnp
from jax import lax
from jax.experimental import pallas as pl
from jax.experimental.pallas import tpu as pltpu


def _gelu_exact(x):
    # x * 0.5 * (1 + erf(x / sqrt(2)))  -- exact GELU, same as the torch module
    return x * 0.5 * (1.0 + jax.scipy.special.erf(x / jnp.sqrt(jnp.float32(2.0))))


def _make_fused_kernel(TB, S, D, H, DK, DFF, V):
    """Fused LM kernel: one grid step = (one batch tile, one layer)."""
    M = TB * S
    scale = 1.0 / float(DK) ** 0.5

    def kernel(x_ref, wq_ref, wk_ref, wv_ref, wo_ref, w1_ref, w2_ref, wl_ref,
               o_ref, x_scr):
        layer = pl.program_id(1)
        n_layers = pl.num_programs(1)

        # --- per-batch-tile init: load embeddings into the resident activation.
        @pl.when(layer == 0)
        def _init():
            x_scr[...] = x_ref[...]

        x2d = x_scr[...]                                    # (M, D) resident act

        # --- QKV projections: full-width GEMMs, batch*seq folded into M;
        #     1/sqrt(dk) folded into q.
        q2d = jnp.dot(x2d, wq_ref[...], preferred_element_type=jnp.float32) * scale
        k2d = jnp.dot(x2d, wk_ref[...], preferred_element_type=jnp.float32)
        v2d = jnp.dot(x2d, wv_ref[...], preferred_element_type=jnp.float32)

        # --- gather head slices into one batched (H*TB, S, DK) tensor so the
        #     whole attention core is two batched contractions (no per-head
        #     dots, no (H,S,S) stack, no Python TB unroll).
        def to_heads(t2d):
            return jnp.concatenate(
                [t2d[:, h * DK:(h + 1) * DK].reshape(TB, S, DK)
                 for h in range(H)],
                axis=0)                                     # batch idx = h*TB + t

        q_bh = to_heads(q2d)
        k_bh = to_heads(k2d)
        v_bh = to_heads(v2d)

        scores = jnp.einsum("bqd,bkd->bqk", q_bh, k_bh,
                            preferred_element_type=jnp.float32)   # (H*TB, S, S)

        # Inline causal mask (no VMEM scratch): large finite negative instead of
        # -inf (NaN-safe); exp() underflows to exactly 0 either way.
        row = lax.broadcasted_iota(jnp.int32, (S, S), 0)
        col = lax.broadcasted_iota(jnp.int32, (S, S), 1)
        neg_mask = jnp.where(col > row, jnp.float32(-1e30), jnp.float32(0.0))
        scores = scores + neg_mask[None, :, :]

        # --- fused softmax over all heads / batch elements.
        m = jnp.max(scores, axis=-1, keepdims=True)
        e = jnp.exp(scores - m)
        denom = jnp.sum(e, axis=-1, keepdims=True)
        p = e * pl.reciprocal(denom, approx=True)

        attn_bh = jnp.einsum("bqk,bkd->bqd", p, v_bh,
                             preferred_element_type=jnp.float32)  # (H*TB, S, DK)

        # --- reassemble lane-dense (M, D) head-concat in registers and do ONE
        #     output-projection GEMM (no attn_scr, no masked narrow stores).
        attn_cat = jnp.concatenate(
            [attn_bh[h * TB:(h + 1) * TB].reshape(M, DK) for h in range(H)],
            axis=-1)                                        # (M, D)
        attn_out = jnp.dot(attn_cat, wo_ref[...],
                           preferred_element_type=jnp.float32)
        x1 = x2d + attn_out                                 # residual (pdrop=None)

        # --- FFN: (M,D)@(D,DFF) -> GELU -> (M,DFF)@(DFF,D).
        h1 = jnp.dot(x1, w1_ref[...], preferred_element_type=jnp.float32)
        ffn = jnp.dot(_gelu_exact(h1), w2_ref[...],
                      preferred_element_type=jnp.float32)
        x_new = x1 + ffn                                    # residual (pdrop=None)
        x_scr[...] = x_new

        # --- last layer: fused LM head, write the lane-dense 2D logits block.
        @pl.when(layer == n_layers - 1)
        def _head():
            o_ref[...] = jnp.dot(x_new, wl_ref[...],
                                 preferred_element_type=jnp.float32)   # (M, V)

    return kernel


def norm_ablation_lm_forward(tokens, params, num_heads, *, batch_tile=None):
    """Fused forward pass: embedding gathers in plain JAX, the rest in one kernel."""
    tok_emb = params["tok_emb"]
    pos_emb = params["pos_emb"]
    B, S = tokens.shape
    D = tok_emb.shape[1]
    V = params["lm_head_t"].shape[1]
    L = params["wq"].shape[0]
    DFF = params["w1"].shape[2]
    H = num_heads
    assert D % H == 0, "d_model must be divisible by num_heads"
    DK = D // H
    TB = B if batch_tile is None else batch_tile
    assert B % TB == 0, "batch must be divisible by batch_tile"
    assert S % 8 == 0, "seq len must be a multiple of 8 (sublane alignment)"

    # Embedding gathers are glue (no hot-path compute); done in plain JAX.
    # The kernel works on a lane-dense 2D (B*S, D) activation slab.
    x2d = (tok_emb[tokens] + pos_emb[:S][None, :, :]).reshape(B * S, D)

    kernel = _make_fused_kernel(TB, S, D, H, DK, DFF, V)

    # Advisory cost hint for the XLA scheduler.
    flops_layer = 2 * B * S * D * (4 * D + 2 * DFF) + 4 * B * H * S * S * DK
    cost = pl.CostEstimate(
        flops=int(L * flops_layer + 2 * B * S * D * V),
        transcendentals=int(L * B * (H * S * S + S * DFF)),
        bytes_accessed=int(4 * (L * (4 * D * D + 2 * D * DFF)
                                + D * V + 2 * B * S * D + B * S * V)),
    )

    M = TB * S
    out2d = pl.pallas_call(
        kernel,
        out_shape=jax.ShapeDtypeStruct((B * S, V), jnp.float32),
        grid=(B // TB, L),
        in_specs=[
            pl.BlockSpec((M, D), lambda bt, l: (bt, 0)),          # embeddings
            pl.BlockSpec((None, D, D), lambda bt, l: (l, 0, 0)),  # Wq^T (streamed)
            pl.BlockSpec((None, D, D), lambda bt, l: (l, 0, 0)),  # Wk^T
            pl.BlockSpec((None, D, D), lambda bt, l: (l, 0, 0)),  # Wv^T
            pl.BlockSpec((None, D, D), lambda bt, l: (l, 0, 0)),  # Wo^T
            pl.BlockSpec((None, D, DFF), lambda bt, l: (l, 0, 0)),  # W1^T
            pl.BlockSpec((None, DFF, D), lambda bt, l: (l, 0, 0)),  # W2^T
            pl.BlockSpec((D, V), lambda bt, l: (0, 0)),           # lm_head^T (resident)
        ],
        out_specs=pl.BlockSpec((M, V), lambda bt, l: (bt, 0)),
        scratch_shapes=[
            pltpu.VMEM((M, D), jnp.float32),   # resident activation across layers
        ],
        compiler_params=pltpu.CompilerParams(
            dimension_semantics=("parallel", "arbitrary"),
            # Raise scoped VMEM for the streamed weight double-buffers; tune per
            # chip at real sizes (up to 128 MiB on v5e/v6e, < 64 MiB on v7x).
            vmem_limit_bytes=64 << 20),
        cost_estimate=cost,
    )(x2d, params["wq"], params["wk"], params["wv"], params["wo"],
      params["w1"], params["w2"], params["lm_head_t"])

    return out2d.reshape(B, S, V)


def ref_forward(tokens, params, num_heads):
    """Pure-JAX reference replicating the PyTorch forward semantics."""
    hp = lax.Precision.HIGHEST
    B, S = tokens.shape
    x = params["tok_emb"][tokens] + params["pos_emb"][:S][None, :, :]
    D = x.shape[-1]
    dk = D // num_heads
    L = params["wq"].shape[0]
    mask = jnp.triu(jnp.ones((S, S), dtype=bool), k=1)
    for l in range(L):
        q = jnp.einsum("bsd,de->bse", x, params["wq"][l], precision=hp)
        k = jnp.einsum("bsd,de->bse", x, params["wk"][l], precision=hp)
        v = jnp.einsum("bsd,de->bse", x, params["wv"][l], precision=hp)
        q = q.reshape(B, S, num_heads, dk).transpose(0, 2, 1, 3)
        k = k.reshape(B, S, num_heads, dk).transpose(0, 2, 1, 3)
        v = v.reshape(B, S, num_heads, dk).transpose(0, 2, 1, 3)
        s = jnp.einsum("bhqd,bhkd->bhqk", q, k, precision=hp) / jnp.sqrt(jnp.float32(dk))
        s = jnp.where(mask, -jnp.inf, s)
        e = jnp.exp(s - jnp.max(s, axis=-1, keepdims=True))
        p = e / jnp.sum(e, axis=-1, keepdims=True)
        a = jnp.einsum("bhqk,bhkd->bhqd", p, v, precision=hp)
        a = a.transpose(0, 2, 1, 3).reshape(B, S, D)
        x = x + jnp.einsum("bsd,de->bse", a, params["wo"][l], precision=hp)
        h1 = jnp.einsum("bsd,df->bsf", x, params["w1"][l], precision=hp)
        x = x + jnp.einsum("bsf,fd->bsd", _gelu_exact(h1), params["w2"][l], precision=hp)
    return jnp.einsum("bsd,dv->bsv", x, params["lm_head_t"], precision=hp)


def init_params(key, vocab, ctx, d_model, num_heads, d_ff, n_layers, std=0.1):
    """Torch-layout weights generated then pre-transposed + stacked over layers."""
    keys = jax.random.split(key, 3 + n_layers)

    def t(w):  # nn.Linear weight (out, in) -> (in, out) so kernels do x @ W^T
        return jnp.transpose(w)

    wq, wk, wv, wo, w1, w2 = [], [], [], [], [], []
    for l in range(n_layers):
        lk = jax.random.split(keys[3 + l], 6)
        wq.append(t(std * jax.random.normal(lk[0], (d_model, d_model), jnp.float32)))
        wk.append(t(std * jax.random.normal(lk[1], (d_model, d_model), jnp.float32)))
        wv.append(t(std * jax.random.normal(lk[2], (d_model, d_model), jnp.float32)))
        wo.append(t(std * jax.random.normal(lk[3], (d_model, d_model), jnp.float32)))
        w1.append(t(std * jax.random.normal(lk[4], (d_ff, d_model), jnp.float32)))
        w2.append(t(std * jax.random.normal(lk[5], (d_model, d_ff), jnp.float32)))
    return {
        "tok_emb": std * jax.random.normal(keys[0], (vocab, d_model), jnp.float32),
        "pos_emb": std * jax.random.normal(keys[1], (ctx, d_model), jnp.float32),
        "lm_head_t": t(std * jax.random.normal(keys[2], (vocab, d_model), jnp.float32)),
        "wq": jnp.stack(wq), "wk": jnp.stack(wk), "wv": jnp.stack(wv),
        "wo": jnp.stack(wo), "w1": jnp.stack(w1), "w2": jnp.stack(w2),
    }


if __name__ == "__main__":
    D_MODEL, NUM_HEADS, D_FF = 32, 4, 64
    VOCAB, CTX, N_LAYERS = 64, 16, 2
    B, S = 2, 8

    key = jax.random.PRNGKey(0)
    pkey, tkey = jax.random.split(key)
    params = init_params(pkey, VOCAB, CTX, D_MODEL, NUM_HEADS, D_FF, N_LAYERS)
    tokens = jax.random.randint(tkey, (B, S), 0, VOCAB, dtype=jnp.int32)

    logits = norm_ablation_lm_forward(tokens, params, NUM_HEADS)
    jax.block_until_ready(logits)

    ref = ref_forward(tokens, params, NUM_HEADS)
    assert logits.shape == (B, S, VOCAB)
    max_err = float(jnp.max(jnp.abs(logits - ref)))
    assert jnp.allclose(logits, ref, atol=1e-3, rtol=1e-3), f"max_err={max_err}"

    print("KERNEL_OK")
</pallas_src>

<mosaic_0001>
module attributes {stable_mosaic.version = 11 : i64} {
  func.func @kernel(%arg0: i32, %arg1: i32, %arg2: memref<16x32xf32, #tpu.memory_space<vmem>>, %arg3: memref<1x32x32xf32, #tpu.memory_space<vmem>>, %arg4: memref<1x32x32xf32, #tpu.memory_space<vmem>>, %arg5: memref<1x32x32xf32, #tpu.memory_space<vmem>>, %arg6: memref<1x32x32xf32, #tpu.memory_space<vmem>>, %arg7: memref<1x32x64xf32, #tpu.memory_space<vmem>>, %arg8: memref<1x64x32xf32, #tpu.memory_space<vmem>>, %arg9: memref<32x64xf32, #tpu.memory_space<vmem>>, %arg10: memref<16x64xf32, #tpu.memory_space<vmem>>, %arg11: memref<16x32xf32, #tpu.memory_space<vmem>>) attributes {dimension_semantics = [#tpu.dimension_semantics<parallel>, #tpu.dimension_semantics<arbitrary>], iteration_bounds = array<i64: 1, 2>, scalar_prefetch = 0 : i64, scratch_operands = 1 : i64, tpu.core_type = #tpu.core_type<tc>, window_params = [{transform_indices = @transform_0, window_bounds = array<i64: 16, 32>}, {transform_indices = @transform_1, window_bounds = array<i64: 1, 32, 32>}, {transform_indices = @transform_2, window_bounds = array<i64: 1, 32, 32>}, {transform_indices = @transform_3, window_bounds = array<i64: 1, 32, 32>}, {transform_indices = @transform_4, window_bounds = array<i64: 1, 32, 32>}, {transform_indices = @transform_5, window_bounds = array<i64: 1, 32, 64>}, {transform_indices = @transform_6, window_bounds = array<i64: 1, 64, 32>}, {pipeline_mode = #tpu.pipeline_mode<synchronous>, transform_indices = @transform_7, window_bounds = array<i64: 32, 64>}, {transform_indices = @transform_8, window_bounds = array<i64: 16, 64>}]} {
    %c0_i32 = arith.constant 0 : i32
    %0 = arith.cmpi eq, %arg1, %c0_i32 : i32
    %1 = arith.extui %0 : i1 to i32
    %c0_i32_0 = arith.constant 0 : i32
    %2 = arith.cmpi ne, %1, %c0_i32_0 : i32
    scf.if %2 {
      %c0_38 = arith.constant 0 : index
      %c0_39 = arith.constant 0 : index
      %96 = vector.load %arg2[%c0_38, %c0_39] : memref<16x32xf32, #tpu.memory_space<vmem>>, vector<16x32xf32>
      %c0_40 = arith.constant 0 : index
      %c0_41 = arith.constant 0 : index
      %97 = vector.load %arg11[%c0_40, %c0_41] : memref<16x32xf32, #tpu.memory_space<vmem>>, vector<16x32xf32>
      tpu.vector_store %arg11[%c0_40, %c0_41], %96 {strides = array<i32>} : memref<16x32xf32, #tpu.memory_space<vmem>>, vector<16x32xf32>,
    } else {
    }
    %c0 = arith.constant 0 : index
    %c0_1 = arith.constant 0 : index
    %3 = vector.load %arg11[%c0, %c0_1] : memref<16x32xf32, #tpu.memory_space<vmem>>, vector<16x32xf32>
    %c0_2 = arith.constant 0 : index
    %c0_3 = arith.constant 0 : index
    %c0_4 = arith.constant 0 : index
    %4 = vector.load %arg3[%c0_2, %c0_3, %c0_4] : memref<1x32x32xf32, #tpu.memory_space<vmem>>, vector<1x32x32xf32>
    %5 = vector.shape_cast %4 : vector<1x32x32xf32> to vector<32x32xf32>
    %cst = arith.constant dense<0.000000e+00> : vector<16x32xf32>
    %6 = tpu.matmul %3, %5, %cst {dimension_numbers = #tpu.dot_dimension_numbers<[1], [0], [0], [1], [0, 0, 1, 1], [], []>} : vector<16x32xf32>, vector<32x32xf32>, vector<16x32xf32> -> vector<16x32xf32>
    %cst_5 = arith.constant 0.353553385 : f32
    %7 = vector.broadcast %cst_5 : f32 to vector<16x32xf32>
    %8 = arith.mulf %6, %7 : vector<16x32xf32>
    %c0_6 = arith.constant 0 : index
    %c0_7 = arith.constant 0 : index
    %c0_8 = arith.constant 0 : index
    %9 = vector.load %arg4[%c0_6, %c0_7, %c0_8] : memref<1x32x32xf32, #tpu.memory_space<vmem>>, vector<1x32x32xf32>
    %10 = vector.shape_cast %9 : vector<1x32x32xf32> to vector<32x32xf32>
    %cst_9 = arith.constant dense<0.000000e+00> : vector<16x32xf32>
    %11 = tpu.matmul %3, %10, %cst_9 {dimension_numbers = #tpu.dot_dimension_numbers<[1], [0], [0], [1], [0, 0, 1, 1], [], []>} : vector<16x32xf32>, vector<32x32xf32>, vector<16x32xf32> -> vector<16x32xf32>
    %c0_10 = arith.constant 0 : index
    %c0_11 = arith.constant 0 : index
    %c0_12 = arith.constant 0 : index
    %12 = vector.load %arg5[%c0_10, %c0_11, %c0_12] : memref<1x32x32xf32, #tpu.memory_space<vmem>>, vector<1x32x32xf32>
    %13 = vector.shape_cast %12 : vector<1x32x32xf32> to vector<32x32xf32>
    %cst_13 = arith.constant dense<0.000000e+00> : vector<16x32xf32>
    %14 = tpu.matmul %3, %13, %cst_13 {dimension_numbers = #tpu.dot_dimension_numbers<[1], [0], [0], [1], [0, 0, 1, 1], [], []>} : vector<16x32xf32>, vector<32x32xf32>, vector<16x32xf32> -> vector<16x32xf32>
    %15 = vector.extract_strided_slice %8 {offsets = [0, 0], sizes = [16, 8], strides = [1, 1]} : vector<16x32xf32> to vector<16x8xf32>
    %16 = vector.shape_cast %15 : vector<16x8xf32> to vector<2x8x8xf32>
    %17 = vector.extract_strided_slice %8 {offsets = [0, 8], sizes = [16, 8], strides = [1, 1]} : vector<16x32xf32> to vector<16x8xf32>
    %18 = vector.shape_cast %17 : vector<16x8xf32> to vector<2x8x8xf32>
    %19 = vector.extract_strided_slice %8 {offsets = [0, 16], sizes = [16, 8], strides = [1, 1]} : vector<16x32xf32> to vector<16x8xf32>
    %20 = vector.shape_cast %19 : vector<16x8xf32> to vector<2x8x8xf32>
    %21 = vector.extract_strided_slice %8 {offsets = [0, 24], sizes = [16, 8], strides = [1, 1]} : vector<16x32xf32> to vector<16x8xf32>
    %22 = vector.shape_cast %21 : vector<16x8xf32> to vector<2x8x8xf32>
    %23 = tpu.concatenate %16, %18, %20, %22 in 0 : vector<2x8x8xf32>, vector<2x8x8xf32>, vector<2x8x8xf32>, vector<2x8x8xf32> -> vector<8x8x8xf32>
    %24 = vector.extract_strided_slice %11 {offsets = [0, 0], sizes = [16, 8], strides = [1, 1]} : vector<16x32xf32> to vector<16x8xf32>
    %25 = vector.shape_cast %24 : vector<16x8xf32> to vector<2x8x8xf32>
    %26 = vector.extract_strided_slice %11 {offsets = [0, 8], sizes = [16, 8], strides = [1, 1]} : vector<16x32xf32> to vector<16x8xf32>
    %27 = vector.shape_cast %26 : vector<16x8xf32> to vector<2x8x8xf32>
    %28 = vector.extract_strided_slice %11 {offsets = [0, 16], sizes = [16, 8], strides = [1, 1]} : vector<16x32xf32> to vector<16x8xf32>
    %29 = vector.shape_cast %28 : vector<16x8xf32> to vector<2x8x8xf32>
    %30 = vector.extract_strided_slice %11 {offsets = [0, 24], sizes = [16, 8], strides = [1, 1]} : vector<16x32xf32> to vector<16x8xf32>
    %31 = vector.shape_cast %30 : vector<16x8xf32> to vector<2x8x8xf32>
    %32 = tpu.concatenate %25, %27, %29, %31 in 0 : vector<2x8x8xf32>, vector<2x8x8xf32>, vector<2x8x8xf32>, vector<2x8x8xf32> -> vector<8x8x8xf32>
    %33 = vector.extract_strided_slice %14 {offsets = [0, 0], sizes = [16, 8], strides = [1, 1]} : vector<16x32xf32> to vector<16x8xf32>
    %34 = vector.shape_cast %33 : vector<16x8xf32> to vector<2x8x8xf32>
    %35 = vector.extract_strided_slice %14 {offsets = [0, 8], sizes = [16, 8], strides = [1, 1]} : vector<16x32xf32> to vector<16x8xf32>
    %36 = vector.shape_cast %35 : vector<16x8xf32> to vector<2x8x8xf32>
    %37 = vector.extract_strided_slice %14 {offsets = [0, 16], sizes = [16, 8], strides = [1, 1]} : vector<16x32xf32> to vector<16x8xf32>
    %38 = vector.shape_cast %37 : vector<16x8xf32> to vector<2x8x8xf32>
    %39 = vector.extract_strided_slice %14 {offsets = [0, 24], sizes = [16, 8], strides = [1, 1]} : vector<16x32xf32> to vector<16x8xf32>
    %40 = vector.shape_cast %39 : vector<16x8xf32> to vector<2x8x8xf32>
    %41 = tpu.concatenate %34, %36, %38, %40 in 0 : vector<2x8x8xf32>, vector<2x8x8xf32>, vector<2x8x8xf32>, vector<2x8x8xf32> -> vector<8x8x8xf32>
    "tpu.trace_start"() <{level = 10 : i32, message = "bqd,bkd->bqk"}> : () -> ()
    %cst_14 = arith.constant dense<0.000000e+00> : vector<8x8x8xf32>
    %42 = tpu.matmul %23, %32, %cst_14 {dimension_numbers = #tpu.dot_dimension_numbers<[2], [2], [1], [1], [0, 0, 0, 1, 1, 1], [0], [0]>} : vector<8x8x8xf32>, vector<8x8x8xf32>, vector<8x8x8xf32> -> vector<8x8x8xf32>
    "tpu.trace_stop"() : () -> ()
    %43 = tpu.iota {dimensions = array<i32: 0>} : vector<8x8xi32>
    %44 = tpu.iota {dimensions = array<i32: 1>} : vector<8x8xi32>
    %45 = arith.cmpi sgt, %44, %43 : vector<8x8xi32>
    %cst_15 = arith.constant -1.000000e+30 : f32
    %cst_16 = arith.constant 0.000000e+00 : f32
    %46 = vector.broadcast %cst_15 : f32 to vector<8x8xf32>
    %47 = vector.broadcast %cst_16 : f32 to vector<8x8xf32>
    %48 = arith.select %45, %46, %47 : vector<8x8xi1>, vector<8x8xf32>
    %49 = vector.shape_cast %48 : vector<8x8xf32> to vector<1x8x8xf32>
    %50 = vector.broadcast %49 : vector<1x8x8xf32> to vector<8x8x8xf32>
    %51 = arith.addf %42, %50 : vector<8x8x8xf32>
    %cst_17 = arith.constant dense<0xFF800000> : vector<8x8xf32>
    %52 = vector.multi_reduction <maximumf>, %51, %cst_17 [2] : vector<8x8x8xf32> to vector<8x8xf32>
    %53 = vector.shape_cast %52 : vector<8x8xf32> to vector<8x8x1xf32>
    %54 = vector.broadcast %53 : vector<8x8x1xf32> to vector<8x8x8xf32>
    %55 = arith.subf %51, %54 : vector<8x8x8xf32>
    %56 = math.exp %55 : vector<8x8x8xf32>
    %cst_18 = arith.constant dense<0.000000e+00> : vector<8x8xf32>
    %57 = vector.multi_reduction <add>, %56, %cst_18 [2] : vector<8x8x8xf32> to vector<8x8xf32>
    %58 = vector.shape_cast %57 : vector<8x8xf32> to vector<8x8x1xf32>
    %59 = tpu.reciprocal %58 {approx = true} : vector<8x8x1xf32> -> vector<8x8x1xf32>
    %60 = vector.broadcast %59 : vector<8x8x1xf32> to vector<8x8x8xf32>
    %61 = arith.mulf %56, %60 : vector<8x8x8xf32>
    "tpu.trace_start"() <{level = 10 : i32, message = "bqk,bkd->bqd"}> : () -> ()
    %cst_19 = arith.constant dense<0.000000e+00> : vector<8x8x8xf32>
    %62 = tpu.matmul %61, %41, %cst_19 {dimension_numbers = #tpu.dot_dimension_numbers<[2], [1], [1], [2], [0, 0, 0, 1, 1, 2], [0], [0]>} : vector<8x8x8xf32>, vector<8x8x8xf32>, vector<8x8x8xf32> -> vector<8x8x8xf32>
    "tpu.trace_stop"() : () -> ()
    %63 = vector.extract_strided_slice %62 {offsets = [0, 0, 0], sizes = [2, 8, 8], strides = [1, 1, 1]} : vector<8x8x8xf32> to vector<2x8x8xf32>
    %64 = vector.shape_cast %63 : vector<2x8x8xf32> to vector<16x8xf32>
    %65 = vector.extract_strided_slice %62 {offsets = [2, 0, 0], sizes = [2, 8, 8], strides = [1, 1, 1]} : vector<8x8x8xf32> to vector<2x8x8xf32>
    %66 = vector.shape_cast %65 : vector<2x8x8xf32> to vector<16x8xf32>
    %67 = vector.extract_strided_slice %62 {offsets = [4, 0, 0], sizes = [2, 8, 8], strides = [1, 1, 1]} : vector<8x8x8xf32> to vector<2x8x8xf32>
    %68 = vector.shape_cast %67 : vector<2x8x8xf32> to vector<16x8xf32>
    %69 = vector.extract_strided_slice %62 {offsets = [6, 0, 0], sizes = [2, 8, 8], strides = [1, 1, 1]} : vector<8x8x8xf32> to vector<2x8x8xf32>
    %70 = vector.shape_cast %69 : vector<2x8x8xf32> to vector<16x8xf32>
    %71 = tpu.concatenate %64, %66, %68, %70 in 1 : vector<16x8xf32>, vector<16x8xf32>, vector<16x8xf32>, vector<16x8xf32> -> vector<16x32xf32>
    %c0_20 = arith.constant 0 : index
    %c0_21 = arith.constant 0 : index
    %c0_22 = arith.constant 0 : index
    %72 = vector.load %arg6[%c0_20, %c0_21, %c0_22] : memref<1x32x32xf32, #tpu.memory_space<vmem>>, vector<1x32x32xf32>
    %73 = vector.shape_cast %72 : vector<1x32x32xf32> to vector<32x32xf32>
    %cst_23 = arith.constant dense<0.000000e+00> : vector<16x32xf32>
    %74 = tpu.matmul %71, %73, %cst_23 {dimension_numbers = #tpu.dot_dimension_numbers<[1], [0], [0], [1], [0, 0, 1, 1], [], []>} : vector<16x32xf32>, vector<32x32xf32>, vector<16x32xf32> -> vector<16x32xf32>
    %75 = arith.addf %3, %74 : vector<16x32xf32>
    %c0_24 = arith.constant 0 : index
    %c0_25 = arith.constant 0 : index
    %c0_26 = arith.constant 0 : index
    %76 = vector.load %arg7[%c0_24, %c0_25, %c0_26] : memref<1x32x64xf32, #tpu.memory_space<vmem>>, vector<1x32x64xf32>
    %77 = vector.shape_cast %76 : vector<1x32x64xf32> to vector<32x64xf32>
    %cst_27 = arith.constant dense<0.000000e+00> : vector<16x64xf32>
    %78 = tpu.matmul %75, %77, %cst_27 {dimension_numbers = #tpu.dot_dimension_numbers<[1], [0], [0], [1], [0, 0, 1, 1], [], []>} : vector<16x32xf32>, vector<32x64xf32>, vector<16x64xf32> -> vector<16x64xf32>
    %cst_28 = arith.constant 5.000000e-01 : f32
    %79 = vector.broadcast %cst_28 : f32 to vector<16x64xf32>
    %80 = arith.mulf %78, %79 : vector<16x64xf32>
    %cst_29 = arith.constant 2.000000e+00 : f32
    %81 = math.sqrt %cst_29 : f32
    %82 = vector.broadcast %81 : f32 to vector<16x64xf32>
    %83 = arith.divf %78, %82 : vector<16x64xf32>
    %84 = math.erf %83 : vector<16x64xf32>
    %cst_30 = arith.constant 1.000000e+00 : f32
    %85 = vector.broadcast %cst_30 : f32 to vector<16x64xf32>
    %86 = arith.addf %85, %84 : vector<16x64xf32>
    %87 = arith.mulf %80, %86 : vector<16x64xf32>
    %c0_31 = arith.constant 0 : index
    %c0_32 = arith.constant 0 : index
    %c0_33 = arith.constant 0 : index
    %88 = vector.load %arg8[%c0_31, %c0_32, %c0_33] : memref<1x64x32xf32, #tpu.memory_space<vmem>>, vector<1x64x32xf32>
    %89 = vector.shape_cast %88 : vector<1x64x32xf32> to vector<64x32xf32>
    %cst_34 = arith.constant dense<0.000000e+00> : vector<16x32xf32>
    %90 = tpu.matmul %87, %89, %cst_34 {dimension_numbers = #tpu.dot_dimension_numbers<[1], [0], [0], [1], [0, 0, 1, 1], [], []>} : vector<16x64xf32>, vector<64x32xf32>, vector<16x32xf32> -> vector<16x32xf32>
    %91 = arith.addf %75, %90 : vector<16x32xf32>
    %c0_35 = arith.constant 0 : index
    %c0_36 = arith.constant 0 : index
    %92 = vector.load %arg11[%c0_35, %c0_36] : memref<16x32xf32, #tpu.memory_space<vmem>>, vector<16x32xf32>
    tpu.vector_store %arg11[%c0_35, %c0_36], %91 {strides = array<i32>} : memref<16x32xf32, #tpu.memory_space<vmem>>, vector<16x32xf32>,
    %c1_i32 = arith.constant 1 : i32
    %93 = arith.cmpi eq, %arg1, %c1_i32 : i32
    %94 = arith.extui %93 : i1 to i32
    %c0_i32_37 = arith.constant 0 : i32
    %95 = arith.cmpi ne, %94, %c0_i32_37 : i32
    scf.if %95 {
      %c0_38 = arith.constant 0 : index
      %c0_39 = arith.constant 0 : index
      %96 = vector.load %arg9[%c0_38, %c0_39] : memref<32x64xf32, #tpu.memory_space<vmem>>, vector<32x64xf32>
      %cst_40 = arith.constant dense<0.000000e+00> : vector<16x64xf32>
      %97 = tpu.matmul %91, %96, %cst_40 {dimension_numbers = #tpu.dot_dimension_numbers<[1], [0], [0], [1], [0, 0, 1, 1], [], []>} : vector<16x32xf32>, vector<32x64xf32>, vector<16x64xf32> -> vector<16x64xf32>
      %c0_41 = arith.constant 0 : index
      %c0_42 = arith.constant 0 : index
      %98 = vector.load %arg10[%c0_41, %c0_42] : memref<16x64xf32, #tpu.memory_space<vmem>>, vector<16x64xf32>
      tpu.vector_store %arg10[%c0_41, %c0_42], %97 {strides = array<i32>} : memref<16x64xf32, #tpu.memory_space<vmem>>, vector<16x64xf32>,
    } else {
    }
    return
  }
  func.func @transform_0(%arg0: i32, %arg1: i32) -> (i32, i32) {
    %c0_i32 = arith.constant 0 : i32
    %c0_i32_0 = arith.constant 0 : i32
    return %arg0, %c0_i32 : i32, i32
  }
  func.func @transform_1(%arg0: i32, %arg1: i32) -> (i32, i32, i32) {
    %c0_i32 = arith.constant 0 : i32
    %c0_i32_0 = arith.constant 0 : i32
    %c0_i32_1 = arith.constant 0 : i32
    return %arg1, %c0_i32, %c0_i32_0 : i32, i32, i32
  }
  func.func @transform_2(%arg0: i32, %arg1: i32) -> (i32, i32, i32) {
    %c0_i32 = arith.constant 0 : i32
    %c0_i32_0 = arith.constant 0 : i32
    %c0_i32_1 = arith.constant 0 : i32
    return %arg1, %c0_i32, %c0_i32_0 : i32, i32, i32
  }
  func.func @transform_3(%arg0: i32, %arg1: i32) -> (i32, i32, i32) {
    %c0_i32 = arith.constant 0 : i32
    %c0_i32_0 = arith.constant 0 : i32
    %c0_i32_1 = arith.constant 0 : i32
    return %arg1, %c0_i32, %c0_i32_0 : i32, i32, i32
  }
  func.func @transform_4(%arg0: i32, %arg1: i32) -> (i32, i32, i32) {
    %c0_i32 = arith.constant 0 : i32
    %c0_i32_0 = arith.constant 0 : i32
    %c0_i32_1 = arith.constant 0 : i32
    return %arg1, %c0_i32, %c0_i32_0 : i32, i32, i32
  }
  func.func @transform_5(%arg0: i32, %arg1: i32) -> (i32, i32, i32) {
    %c0_i32 = arith.constant 0 : i32
    %c0_i32_0 = arith.constant 0 : i32
    %c0_i32_1 = arith.constant 0 : i32
    return %arg1, %c0_i32, %c0_i32_0 : i32, i32, i32
  }
  func.func @transform_6(%arg0: i32, %arg1: i32) -> (i32, i32, i32) {
    %c0_i32 = arith.constant 0 : i32
    %c0_i32_0 = arith.constant 0 : i32
    %c0_i32_1 = arith.constant 0 : i32
    return %arg1, %c0_i32, %c0_i32_0 : i32, i32, i32
  }
  func.func @transform_7(%arg0: i32, %arg1: i32) -> (i32, i32) {
    %c0_i32 = arith.constant 0 : i32
    %c0_i32_0 = arith.constant 0 : i32
    %c0_i32_1 = arith.constant 0 : i32
    return %c0_i32, %c0_i32_0 : i32, i32
  }
  func.func @transform_8(%arg0: i32, %arg1: i32) -> (i32, i32) {
    %c0_i32 = arith.constant 0 : i32
    %c0_i32_0 = arith.constant 0 : i32
    return %arg0, %c0_i32 : i32, i32
  }
}

</mosaic_0001>

<bundles_post_ra>
// kernel: tpu_custom_call.1
= control target key start
LH: loop header
LB: loop body
LE: loop exit
PB: predicated region body
PF: predicated region fallthrough
CT: control target
= control target key end

     0   :  { %s2355_s0 = inlined_call_operand.hbm [shape: f32[16,32], index: 0, kind: input, shape index: {}]   ;;  %s2356_s1 = inlined_call_operand.vmem [shape: f32[2,32,32], index: 1, kind: input, shape index: {}]   ;;  %s2357_s2 = inlined_call_operand.vmem [shape: f32[2,32,32], index: 2, kind: input, shape index: {}]   ;;  %s2358_s3 = inlined_call_operand.vmem [shape: f32[2,32,32], index: 3, kind: input, shape index: {}]   ;;  %s2359_s4 = inlined_call_operand.hbm [shape: f32[2,32,32], index: 4, kind: input, shape index: {}]   ;;  %s2360_s5 = inlined_call_operand.hbm [shape: f32[2,32,64], index: 5, kind: input, shape index: {}]   ;;  %s2361_s6 = inlined_call_operand.vmem [shape: f32[2,64,32], index: 6, kind: input, shape index: {}]   ;;  %s2362_s7 = inlined_call_operand.hbm [shape: f32[32,64], index: 7, kind: input, shape index: {}]   ;;  %s2363_s8 = inlined_call_operand.hbm [shape: f32[16,64], index: 8, kind: output, shape index: {}]  }
   0x1   :  { %2365 = sst [smem:[#allocation17_spill]] %s2355_s0 }
   0x2   :  { %2366 = sst [smem:[#allocation18_spill]] %s2359_s4 }
   0x3   :  { %13 = vsyncpa [#allocation4], 0 }
   0x4   :  { %14 = vsyncpa [#allocation7], 0 }
   0x5   :  { %16 = vsyncpa [#allocation7 + $0x1], 0 }
   0x6   :  { %17 = vsyncpa [#allocation10], 0 }
   0x7   :  { %18 = vsyncpa [#allocation5], 0  ;;  %s2050_s27 = smov 0   ;;  %s2052_s28 = smov 0  }
   0x8   :  { %s2054_s29 = smov 0   ;;  %s2056_s30 = smov 0  }
   0x9   :  { %s2058_s9 = smov 0   ;;  %s2060_s10 = smov 0  }
   0xa LB: > { %s33_s11 = sadd.s32 1, %s1985_s9  ;;  %s147_s12 = sadd.s32 1, %s1977_s29  ;;  %s1989_s10 = sphi %s2060_s10, %s24_s10   ;;  %s1985_s9 = sphi %s2058_s9, %s2379_s9   ;;  %s1981_s30 = sphi %s2056_s30, %s2378_s30   ;;  %s1977_s29 = sphi %s2054_s29, %s2377_s29   ;;  %s1973_s28 = sphi %s2052_s28, %s2376_s28   ;;  %s1969_s27 = sphi %s2050_s27, %s2375_s27  }
   0xb   : > { %p34_p0 = scmp.ge.s32.totalorder %s33_s11, 2  ;;  %p154_p1 = scmp.ne.s32.totalorder %s1977_s29, %s1973_s28 }
   0xc   : > { %p155_p2 = scmp.eq.s32.totalorder %s1989_s10, 0  ;;  %p1669_p5 = scmp.lt.s32.totalorder %s1989_s10, 2 }
   0xd   : > { %s2381_s11 = smov (%p34_p0, %s33_s11), 0  ;;  %s338_s15 = sand.u32 1, %s1989_s10  }
   0xe   : > { %2367 = sst [smem:[#allocation16_spill]] %s2381_s11  ;;  %p2087_p3 = por %p155_p2, %p154_p1 }
   0xf   : > { %s144_s14 = ssub.s32 %s1985_s9, %s2381_s11  ;;  %s340_s16 = sand.u32 1, %s1977_s29  }
  0x10   : > { %p145_p4 = scmp.eq.s32.totalorder %s144_s14, 0  ;;  %s1562_s18 = sshll.u32 %s340_s16, 5 }
  0x11   : > { %s1627_s19 = sshll.u32 %s1985_s9, 5  ;;  %s2369_s4 = sld [smem:[#allocation18_spill]] }
  0x12   : > { %s2097_s17 = scalar_select %p145_p4, %s1977_s29, %s147_s12  }
  0x13   : > { %s342_s23 = scalar_lea.vmem [#allocation6], %s1562_s18  ;;  %p2105_p6 = pnand %p1669_p5, %p2087_p3 }
  0x14   : > { %s350_s24 = sshll.u32 %s342_s23, 4  ;;  %s369_s16 = scalar_lea.hbm %s2360_s5, %s1627_s19  ;;  %s351_s24 = int_to_ptr.vmem [resolvable:$true] %s350_s24 }
  0x15   : > { %s370_s20 = sshll.u32 %s369_s16, 4  ;;  %s2112_s21 = scalar_lea.sflag [#allocation7], %s338_s15  ;;  %s2120_s20 = int_to_ptr.hbm [resolvable:$true] %s370_s20 }
  0x16   : > { %s1991_s23 = smov 128   ;;  %s364_s13 = scalar_lea.vmem [#allocation8], %s1562_s18 }
  0x17   : > { %s347_s22 = scalar_lea.hbm %s2369_s4, %s1627_s19  ;;  %s372_s4 = sshll.u32 %s364_s13, 4  ;;  %s373_s4 = int_to_ptr.vmem [resolvable:$true] %s372_s4 }
  0x18   : > { %s348_s25 = sshll.u32 %s347_s22, 4  ;;  %s1992_s22 = smov 8   ;;  %s349_s25 = int_to_ptr.hbm [resolvable:$true] %s348_s25 }
  0x19   : > { %1663 = dma.hbm_to_vmem [thread:$0]  (!%p2105_p6), %s349_s25, 512, %s351_s24, %s2112_s21, %s1991_s23, %s1991_s23, %s1992_s22  }
  0x1a   : > { %s2123_s11 = sadd.s32 4294967295, %s1989_s10   ;;  %p160_p7 = scmp.ne.s32.totalorder %s1973_s28, %s1969_s27 }
  0x1b   : > { %p161_p8 = scmp.eq.s32.totalorder %s2123_s11, 0  ;;  %p1558_p9 = scmp.ge.s32.totalorder %s1989_s10, 1 }
  0x1c   : > { %p270_p10 = scmp.lt.s32.totalorder %s1989_s10, 3  ;;  %s2373_s0 = sld [smem:[#allocation17_spill]] }
  0x1d   : > { %p2132_p11 = por %p161_p8, %p160_p7  ;;  %s1993_s25 = smov [#allocation3]  }
  0x1e   : > { %p2136_p12 = pnand %p1558_p9, %p270_p10  ;;  %s286_s12 = sshll.u32 %s1993_s25, 4  ;;  %s287_s12 = int_to_ptr.vmem [resolvable:$true] %s286_s12 }
  0x1f   : > { %s298_s13 = sshll.u32 %s2362_s7, 4  ;;  %s1994_s18 = smov [#allocation9]   ;;  %s299_s13 = int_to_ptr.hbm [resolvable:$true] %s298_s13 }
  0x20   : > { %p1653_p13 = pneg %p2136_p12  ;;  %s300_s24 = sshll.u32 %s1994_s18, 4  ;;  %s301_s24 = int_to_ptr.vmem [resolvable:$true] %s300_s24 }
  0x21   : > { %1666 = dma.hbm_to_vmem [thread:$0]  (!%p2105_p6), %s2120_s20, 512, %s373_s4, %s2112_s21, %s1991_s23, %s1991_s23, %s1992_s22  }
  0x22   : > { %s284_s27 = sshll.u32 %s2373_s0, 4  ;;  %p1654_p0 = pnand %p1653_p13, %p161_p8  ;;  %s285_s27 = int_to_ptr.hbm [resolvable:$true] %s284_s27 }
  0x23   : > { %392 = sbr.rel (%p2136_p12) target bundleno = 1609 (0x649), region = 52 }
  0x24   : > { %1656 = dma.hbm_to_vmem [thread:$0]  (!%p1654_p0), %s285_s27, 256, %s287_s12, [#allocation4], %s1991_s23, %s1991_s23, %s1992_s22  }
  0x25   : > { %1659 = dma.hbm_to_vmem [thread:$0]  (!%p1654_p0), %s299_s13, 512, %s301_s24, [#allocation10], %s1991_s23, %s1991_s23, %s1992_s22  }
  0x28   : > { %1952 = dma.done.wait (%p161_p8), [#allocation4], 256  }
  0x29   : > { %1954 = vsyncadd (%p161_p8), [#allocation4], 4294967040  ;;  %s399_s27 = sand.u32 1, %s2123_s11   ;;  %s401_s25 = sand.u32 1, %s1973_s28  }
  0x2a   : > { %s1570_s12 = sshll.u32 %s401_s25, 5  ;;  %s400_s26 = scalar_lea.sflag [#allocation7], %s399_s27 }
  0x2b   : > { %s2171_s14 = scalar_lea.vmem [#allocation6], %s1570_s12 }
  0x2c   : > { %1956 = dma.done.wait (%p2132_p11), %s400_s26, 1024  }
  0x2d   : > { %1958 = vsyncadd (%p2132_p11), %s400_s26, 4294966272  ;;  %s2177_s4 = scalar_lea.vmem [#allocation8], %s1570_s12 }
  0x2e   : > { %1960 = dma.done.wait (%p161_p8), [#allocation10], 512  }
  0x2f   : > { %1962 = vsyncadd (%p161_p8), [#allocation10], 4294966784  ;;  %p473_p1 = scmp.lt.s32.totalorder %s1981_s30, 1  ;;  %p1581_p2 = scmp.ne.s32.totalorder %s1981_s30, 0 }
  0x31   : > { %s474_s20 = scalar_select %p473_p1, %s1981_s30, 1 }
  0x32   : > { %497 = sbr.rel (%p1581_p2) target bundleno = 58 (0x3a), region = 72 }
  0x33   : > { %s1629_s21 = sshll.u32 %s474_s20, 5  ;;  %s1632_s23 = sshll.u32 %s474_s20, 6 }
  0x34   : > { %s477_s16 = scalar_lea.vmem %s2356_s1, %s1629_s21  ;;  %s482_s18 = scalar_lea.vmem %s2357_s2, %s1629_s21 }
  0x35   : > { %s2194_s25 = scalar_lea.vmem %s2358_s3, %s1629_s21  ;;  %s2199_s0 = scalar_lea.vmem %s2361_s6, %s1632_s23 }
  0x37   : > { %v498_v0 = vld [vmem:[#allocation3] sm:$0xff]  ;;  %vm500_vm0 = vcmask 261120   ;;  %v499_v1 = vld [vmem:[#allocation3 + $0x8] sm:$0xff] }
  0x38   : > { %501 = vst.msk [vmem:[#allocation2] sm:$0xff] %vm500_vm0, %v498_v0 }
  0x39   : > { %502 = vst.msk [vmem:[#allocation2 + $0x8] sm:$0xff] %vm500_vm0, %v499_v1 }
  0x3a PF: > { %v544_v2 = vld [vmem:[%s482_s18 + $0x18] sm:$0xff]  ;;  %v543_v4 = vld [vmem:[%s482_s18 + $0x10] sm:$0xff]  ;;  %v542_v6 = vld [vmem:[%s482_s18 + $0x8] sm:$0xff]  ;;  %vm509_vm1 = vcmask 261120   ;;  %vm649_vm2 = vcmask 64512   ;;  %s1995_s20 = smov 104   ;;  %v643_v26 = vlaneseq }
  0x3b   : > { %v508_v3 = vld [vmem:[%s477_s16 + $0x18] sm:$0xff]  ;;  %557 = vmatpush.msra.mxu1 %v544_v2  ;;  %v507_v5 = vld [vmem:[%s477_s16 + $0x10] sm:$0xff]  ;;  %v506_v7 = vld [vmem:[%s477_s16 + $0x8] sm:$0xff]  ;;  %s1996_s21 = smov 120   ;;  %s1997_s23 = smov 112   ;;  %v1998_v31 = vmov 0.0  }
  0x3c   : > { %528 = vmatpush.msra.mxu0 %v508_v3  ;;  %v541_v8 = vld [vmem:[%s482_s18] sm:$0xff]  ;;  %v571_v18 = vld [vmem:[%s2194_s25 + $0x18] sm:$0xff]  ;;  %v570_v19 = vld [vmem:[%s2194_s25 + $0x10] sm:$0xff]  ;;  %v644_v27 = vshrl.u32 %v643_v26, 7  ;;  %v646_v28 = vand.u32 127, %v643_v26  ;;  %s1999_s22 = smov 16  }
  0x3d   : > { %558 = vmatpush.msra.mxu1 %v543_v4  ;;  %v505_v9 = vld [vmem:[%s477_s16] sm:$0xff]  ;;  %584 = vmatpush.msra.mxu2 %v571_v18  ;;  %v569_v20 = vld [vmem:[%s2194_s25 + $0x8] sm:$0xff]  ;;  %s2000_s19 = smov 8   ;;  %s2001_s16 = smov 24   ;;  %vm1140_vm4 = vcmask 130048   ;;  %vm1143_vm5 = vcmask 195584  }
  0x3e   : > { %529 = vmatpush.msra.mxu0 %v507_v5  ;;  %v568_v21 = vld [vmem:[%s2194_s25] sm:$0xff]  ;;  %vm647_vm3 = vcmp.gt.s32.totalorder %v646_v28, %v644_v27  ;;  %vm1317_vm11 = vcmask 523264   ;;  %p1620_p3 = scmp.ne.s32.totalorder %s1981_s30, 1 }
  0x3f   : > { %559 = vmatpush.msra.mxu1 %v542_v6  ;;  %v2202_v10 = vld [vmem:[#allocation2] sm:$0xff]  ;;  %585 = vmatpush.msra.mxu2 %v570_v19  ;;  %v648_v32 = vsel %vm647_vm3, -1e+30, %v1998_v31 }
  0x40   : > { %530 = vmatpush.msra.mxu0 %v506_v7  ;;  %v2208_v11 = vld [vmem:[#allocation2 + $0x8] sm:$0xff] }
  0x41   : > { %560 = vmatpush.msra.mxu1 %v541_v8  ;;  %586 = vmatpush.msra.mxu2 %v569_v20 }
  0x42   : > { %531 = vmatpush.msra.mxu0 %v505_v9  ;;  %1584 = vmatmul.msk.f32.vlgmr.msra.gmra.mxu1 %vm509_vm1, %v2202_v10 }
  0x43   : > { %1582 = vmatmul.msk.f32.vlgmr.msra.gmra.mxu0 %vm509_vm1, %v2202_v10  ;;  %587 = vmatpush.msra.mxu2 %v568_v21 }
  0x44   : > { %1586 = vmatmul.msk.f32.vlgmr.msra.gmra.mxu2 %vm509_vm1, %v2202_v10 }
  0x4a   : > { %1585 = vmatmul.msk.f32.gmra.mxu1 %vm509_vm1, %v2208_v11 }
  0x4b   : > { %1583 = vmatmul.msk.f32.gmra.mxu0 %vm509_vm1, %v2208_v11 }
  0x4c   : > { %1587 = vmatmul.msk.f32.gmra.mxu2 %vm509_vm1, %v2208_v11 }
  0xbf   : > { %v562_v12 = vpop.f32.mrf.mxu1 }
  0xc0   : > { %v533_v13 = vpop.f32.mrf.mxu0  ;;  %619 = vrot.lane.b32.xlu1 %v562_v12, %s1995_s20  ;;  %611 = vrot.lane.b32.xlu0 %v562_v12, %s1996_s21 }
  0xc1   : > { %v539_v14 = vmul.f32 0.35355338, %v533_v13  ;;  %1588 = vmatpush.xpose.msk.msrb.mxu0 %vm649_vm2, %v562_v12 }
  0xc4   : > { %1589 = vmatmul.msk.f32.vlgmr.msrb.gmra.mxu0 %vm649_vm2, %v539_v14 }
  0xc7   : > { %v565_v15 = vpop.f32.mrf.mxu1  ;;  %v589_v45 = vpop.f32.mrf.mxu2 }
  0xc8   : > { %v536_v16 = vpop.f32.mrf.mxu0  ;;  %617 = vrot.lane.b32.xlu2 %v565_v15, %s1997_s23  ;;  %1590 = vmatpush.xpose.msk.msra.mxu3 %vm649_vm2, %v565_v15 }
  0xc9   : > { %v540_v17 = vmul.f32 0.35355338, %v536_v16  ;;  %605 = vrot.lane.b32.xlu1 %v539_v14, %s1995_s20  ;;  %597 = vrot.lane.b32.xlu0 %v539_v14, %s1996_s21 }
  0xcb   : > { %1591 = vmatmul.msk.f32.vlgmr.msra.gmra.mxu3 %vm649_vm2, %v540_v17 }
  0xcf   : > { %v2252_v46 = vpop.f32.mrf.mxu2 }
  0xd0   : > { %603 = vrot.lane.b32.xlu2 %v540_v17, %s1997_s23  ;;  %v1736_v3 = vpack.i.bf16 %v2252_v46, %v589_v45 }
  0xd1   : > { %615 = vrot.lane.b32.xlu0 %v562_v12, %s1997_s23  ;;  %613 = vrot.lane.b32.xlu1 %v565_v15, %s1996_s21 }
  0xd8   : > { %601 = vrot.lane.b32.xlu2 %v539_v14, %s1997_s23 }
  0xd9   : > { %599 = vrot.lane.b32.xlu0 %v540_v17, %s1996_s21  ;;  %621 = vrot.lane.b32.xlu1 %v565_v15, %s1995_s20 }
  0xe0   : > { %607 = vrot.lane.b32.xlu2 %v540_v17, %s1995_s20 }
 0x122   : > { %v618_v22 = vpop.permute.xlu2 %617 }
 0x123   : > { %1598 = vmatpush.xpose.msk.msrb.mxu2 %vm649_vm2, %v618_v22 }
 0x127   : > { %971 = vmatpush.msra.mxu2 %v2252_v46 }
 0x12a   : > { %v604_v23 = vpop.permute.xlu2 %603 }
 0x12b   : > { %1599 = vmatmul.msk.f32.vlgmr.msrb.gmra.mxu2 %vm649_vm2, %v604_v23 }
 0x132   : > { %v620_v24 = vpop.permute.xlu1 %619  ;;  %v612_v25 = vpop.permute.xlu0 %611 }
 0x133   : > { %1592 = vmatpush.xpose.msk.msrb.mxu3 %vm649_vm2, %v612_v25  ;;  %v602_v38 = vpop.permute.xlu2 %601 }
 0x137   : > { %1600 = vmatpush.xpose.msk.msra.mxu3 %vm649_vm2, %v620_v24 }
 0x13b   : > { %v606_v29 = vpop.permute.xlu1 %605  ;;  %v598_v30 = vpop.permute.xlu0 %597 }
 0x13c   : > { %1593 = vmatmul.msk.f32.vlgmr.msrb.gmra.mxu3 %vm649_vm2, %v598_v30  ;;  %v608_v44 = vpop.permute.xlu2 %607 }
 0x141   : > { %v671_v33 = vpop.f32.mrf.mxu0 }
 0x142   : > { %v672_v34 = vadd.f32 %v671_v33, %v648_v32 }
 0x143   : > { %v616_v35 = vpop.permute.xlu0 %615  ;;  %v614_v36 = vpop.permute.xlu1 %613 }
 0x144   : > { %1596 = vmatpush.xpose.msk.msrb.mxu1 %vm649_vm2, %v616_v35  ;;  %1601 = vmatmul.msk.f32.vlgmr.msra.gmra.mxu3 %vm649_vm2, %v606_v29  ;;  %v842_v37 = vsel %vm649_vm2, %v672_v34, -inf }
 0x145   : > { %843 = vmax.xlane.f32.xlu1 %v842_v37  ;;  %1594 = vmatpush.xpose.msk.msra.mxu0 %vm649_vm2, %v614_v36 }
 0x147   : > { %1597 = vmatmul.msk.f32.vlgmr.msrb.gmra.mxu1 %vm649_vm2, %v602_v38 }
 0x148   : > { %948 = vmatpush.msra.mxu1 %v589_v45 }
 0x14b   : > { %v600_v39 = vpop.permute.xlu0 %599  ;;  %v622_v40 = vpop.permute.xlu1 %621 }
 0x14c   : > { %1595 = vmatmul.msk.f32.vlgmr.msra.gmra.mxu0 %vm649_vm2, %v600_v39 }
 0x14d   : > { %1602 = vmatpush.xpose.msk.msrb.mxu0 %vm649_vm2, %v622_v40 }
 0x14e   : > { %v695_v41 = vpop.f32.mrf.mxu3 }
 0x14f   : > { %v696_v42 = vadd.f32 %v695_v41, %v648_v32 }
 0x151   : > { %v845_v43 = vsel %vm649_vm2, %v696_v42, -inf }
 0x152   : > { %846 = vmax.xlane.f32.xlu2 %v845_v43 }
 0x154   : > { %1603 = vmatmul.msk.f32.vlgmr.msrb.gmra.mxu0 %vm649_vm2, %v608_v44 }
 0x1ae   : > { %v791_v63 = vpop.f32.mrf.mxu2 }
 0x1af   : > { %v792_v1 = vadd.f32 %v791_v63, %v648_v32 }
 0x1b1   : > { %v857_v2 = vsel %vm649_vm2, %v792_v1, -inf }
 0x1b8   : > { %v844_v47 = vpop.xlane.xlu1 %843 }
 0x1b9   : > { %v866_v48 = vsub.f32 %v672_v34, %v844_v47 }
 0x1bb   : > { %v874_v49 = vmul.f32 1.442695, %v866_v48 }
 0x1bd   : > { %1741 = vpow2.f32 %v874_v49 }
 0x1bf   : > { %v719_v50 = vpop.f32.mrf.mxu3 }
 0x1c0   : > { %v720_v60 = vadd.f32 %v719_v50, %v648_v32 }
 0x1c2   : > { %v848_v0 = vsel %vm649_vm2, %v720_v60, -inf }
 0x1c3   : > { %v1742_v51 = vpop.eup %1741 }
 0x1c4   : > { %v767_v52 = vpop.f32.mrf.mxu1  ;;  %v890_v53 = vsel %vm649_vm2, %v1742_v51, 0.0 }
 0x1c5   : > { %v768_v54 = vadd.f32 %v767_v52, %v648_v32  ;;  %891 = vadd.xlane.f32.xlu2 %v890_v53  ;;  %v847_v4 = vpop.xlane.xlu2 %846 }
 0x1c6   : > { %v867_v5 = vsub.f32 %v696_v42, %v847_v4 }
 0x1c7   : > { %v815_v55 = vpop.f32.mrf.mxu3  ;;  %v854_v56 = vsel %vm649_vm2, %v768_v54, -inf }
 0x1c8   : > { %v816_v57 = vadd.f32 %v815_v55, %v648_v32  ;;  %855 = vmax.xlane.f32.xlu0 %v854_v56  ;;  %v876_v7 = vmul.f32 1.442695, %v867_v5 }
 0x1c9   : > { %v743_v58 = vpop.f32.mrf.mxu0 }
 0x1ca   : > { %v744_v59 = vadd.f32 %v743_v58, %v648_v32  ;;  %v860_v62 = vsel %vm649_vm2, %v816_v57, -inf  ;;  %1743 = vpow2.f32 %v876_v7 }
 0x1cc   : > { %v851_v61 = vsel %vm649_vm2, %v744_v59, -inf }
 0x1cd   : > { %852 = vmax.xlane.f32.xlu1 %v851_v61  ;;  %861 = vmax.xlane.f32.xlu2 %v860_v62 }
 0x1d0   : > { %849 = vmax.xlane.f32.xlu0 %v848_v0  ;;  %v2266_v12 = vpop.eup %1743 }
 0x1d1   : > { %v839_v6 = vpop.f32.mrf.mxu0  ;;  %v893_v13 = vsel %vm649_vm2, %v2266_v12, 0.0 }
 0x1d2   : > { %v840_v8 = vadd.f32 %v839_v6, %v648_v32 }
 0x1d4   : > { %v863_v9 = vsel %vm649_vm2, %v840_v8, -inf }
 0x1d5   : > { %858 = vmax.xlane.f32.xlu2 %v857_v2 }
 0x1e4   : > { %1737 = vrot.lane.b32.xlu0 %v1736_v3, %s1997_s23 }
 0x1e6   : > { %637 = vrot.lane.b32.xlu1 %v589_v45, %s1995_s20 }
 0x1ed   : > { %625 = vrot.lane.b32.xlu2 %v589_v45, %s1996_s21 }
 0x20e   : > { %864 = vmax.xlane.f32.xlu0 %v863_v9 }
 0x216   : > { %894 = vadd.xlane.f32.xlu0 %v893_v13 }
 0x238   : > { %v892_v14 = vpop.xlane.xlu2 %891 }
 0x239   : > { %1745 = vrcp.f32 %v892_v14 }
 0x23b   : > { %v856_v15 = vpop.xlane.xlu0 %855 }
 0x23c   : > { %v870_v16 = vsub.f32 %v768_v54, %v856_v15 }
 0x23e   : > { %v882_v17 = vmul.f32 1.442695, %v870_v16 }
 0x23f   : > { %v1746_v18 = vpop.eup %1745 }
 0x240   : > { %v922_v19 = vmul.f32 %v1746_v18, %v1742_v51  ;;  %1747 = vpow2.f32 %v882_v17  ;;  %v862_v20 = vpop.xlane.xlu2 %861  ;;  %v853_v21 = vpop.xlane.xlu1 %852 }
 0x241   : > { %v869_v25 = vsub.f32 %v744_v59, %v853_v21  ;;  %v872_v33 = vsub.f32 %v816_v57, %v862_v20  ;;  %v1149_v21 = vld [vmem:[%s2171_s14 + $0x18] sm:$0xff] }
 0x242   : > { %1604 = vmatmul.msk.f32.vlgmr.msra.gmra.mxu1 %vm649_vm2, %v922_v19 }
 0x243   : > { %v850_v22 = vpop.xlane.xlu0 %849  ;;  %v880_v30 = vmul.f32 1.442695, %v869_v25  ;;  %v886_v36 = vmul.f32 1.442695, %v872_v33 }
 0x244   : > { %v868_v23 = vsub.f32 %v720_v60, %v850_v22  ;;  %v1148_v22 = vld [vmem:[%s2171_s14 + $0x10] sm:$0xff] }
 0x246   : > { %v1748_v24 = vpop.eup %1747  ;;  %v878_v26 = vmul.f32 1.442695, %v868_v23  ;;  %v1147_v23 = vld [vmem:[%s2171_s14 + $0x8] sm:$0xff] }
 0x247   : > { %v902_v27 = vsel %vm649_vm2, %v1748_v24, 0.0 }
 0x248   : > { %1749 = vpow2.f32 %v878_v26  ;;  %903 = vadd.xlane.f32.xlu0 %v902_v27  ;;  %v859_v28 = vpop.xlane.xlu2 %858 }
 0x249   : > { %v871_v29 = vsub.f32 %v792_v1, %v859_v28 }
 0x24b   : > { %v884_v31 = vmul.f32 1.442695, %v871_v29 }
 0x24d   : > { %1751 = vpow2.f32 %v884_v31  ;;  %v1184_v31 = vld [vmem:[%s2177_s4 + $0x18] sm:$0xff] }
 0x24e   : > { %v1750_v32 = vpop.eup %1749  ;;  %1753 = vpow2.f32 %v880_v30 }
 0x24f   : > { %v896_v34 = vsel %vm649_vm2, %v1750_v32, 0.0  ;;  %1755 = vpow2.f32 %v886_v36 }
 0x250   : > { %897 = vadd.xlane.f32.xlu1 %v896_v34  ;;  %v626_v35 = vpop.permute.xlu2 %625 }
 0x251   : > { %994 = vmatpush.msrb.mxu3 %v626_v35 }
 0x253   : > { %v1752_v37 = vpop.eup %1751 }
 0x254   : > { %v1754_v38 = vpop.eup %1753  ;;  %v905_v39 = vsel %vm649_vm2, %v1752_v37, 0.0 }
 0x255   : > { %906 = vadd.xlane.f32.xlu0 %v905_v39  ;;  %v899_v41 = vsel %vm649_vm2, %v1754_v38, 0.0  ;;  %v1756_v45 = vpop.eup %1755  ;;  %v1182_v39 = vld [vmem:[%s2177_s4 + $0x8] sm:$0xff] }
 0x256   : > { %v1738_v40 = vpop.permute.xlu0 %1737  ;;  %v908_v47 = vsel %vm649_vm2, %v1756_v45, 0.0 }
 0x257   : > { %v1740_v42 = vunpack.i.h.bf16 %v1738_v40  ;;  %v1739_v43 = vunpack.i.l.bf16 %v1738_v40  ;;  %v1181_v40 = vld [vmem:[%s2177_s4] sm:$0xff] }
 0x258   : > { %900 = vadd.xlane.f32.xlu1 %v899_v41  ;;  %v638_v44 = vpop.permute.xlu1 %637 }
 0x259   : > { %1086 = vmatpush.msra.mxu3 %v638_v44  ;;  %1040 = vmatpush.msrb.mxu1 %v1739_v43 }
 0x25a   : > { %1063 = vmatpush.msrb.mxu2 %v1740_v42 }
 0x25b   : > { %1168 = vmatpush.msra.mxu1 %v1149_v21 }
 0x25d   : > { %1169 = vmatpush.msra.mxu1 %v1148_v22 }
 0x25f   : > { %1170 = vmatpush.msra.mxu1 %v1147_v23 }
 0x260   : > { %909 = vadd.xlane.f32.xlu1 %v908_v47  ;;  %v1315_v47 = vld [vmem:[%s2199_s0 + $0x30] sm:$0xff] }
 0x269   : > { %639 = vrot.lane.b32.xlu0 %v2252_v46, %s1995_s20 }
 0x279   : > { %627 = vrot.lane.b32.xlu1 %v2252_v46, %s1996_s21 }
 0x281   : > { %v865_v48 = vpop.xlane.xlu0 %864 }
 0x282   : > { %v873_v49 = vsub.f32 %v840_v8, %v865_v48  ;;  %v2002_v48 = vmov 1.4142135  }
 0x284   : > { %v888_v50 = vmul.f32 1.442695, %v873_v49 }
 0x286   : > { %1757 = vpow2.f32 %v888_v50 }
 0x289   : > { %v895_v51 = vpop.xlane.xlu0 %894 }
 0x28a   : > { %1759 = vrcp.f32 %v895_v51 }
 0x28c   : > { %v1758_v52 = vpop.eup %1757 }
 0x28d   : > { %v911_v53 = vsel %vm649_vm2, %v1758_v52, 0.0 }
 0x28e   : > { %912 = vadd.xlane.f32.xlu2 %v911_v53 }
 0x290   : > { %v1760_v54 = vpop.eup %1759 }
 0x291   : > { %v923_v55 = vmul.f32 %v1760_v54, %v2266_v12 }
 0x293   : > { %1605 = vmatmul.msk.f32.vlgmr.msra.gmra.mxu2 %vm649_vm2, %v923_v55 }
 0x294   : > { %1203 = vmatpush.msra.mxu2 %v1184_v31 }
 0x2bb   : > { %v904_v56 = vpop.xlane.xlu0 %903 }
 0x2bc   : > { %1761 = vrcp.f32 %v904_v56 }
 0x2bf   : > { %v950_v13 = vpop.f32.mrf.mxu1 }
 0x2c2   : > { %v1762_v57 = vpop.eup %1761 }
 0x2c3   : > { %v926_v58 = vmul.f32 %v1762_v57, %v1748_v24  ;;  %v898_v46 = vpop.xlane.xlu1 %897  ;;  %v1146_v24 = vld [vmem:[%s2171_s14] sm:$0xff] }
 0x2c4   : > { %1763 = vrcp.f32 %v898_v46  ;;  %1171 = vmatpush.msra.mxu1 %v1146_v24 }
 0x2c5   : > { %1608 = vmatmul.msk.f32.vlgmr.msrb.gmra.mxu1 %vm649_vm2, %v926_v58 }
 0x2c8   : > { %v907_v59 = vpop.xlane.xlu0 %906 }
 0x2c9   : > { %1765 = vrcp.f32 %v907_v59 }
 0x2ca   : > { %v1764_v60 = vpop.eup %1763 }
 0x2cb   : > { %v924_v61 = vmul.f32 %v1764_v60, %v1750_v32  ;;  %v901_v62 = vpop.xlane.xlu1 %900  ;;  %v1183_v32 = vld [vmem:[%s2177_s4 + $0x10] sm:$0xff]  ;;  %v1314_v60 = vld [vmem:[%s2199_s0 + $0x28] sm:$0xff] }
 0x2cc   : > { %1204 = vmatpush.msra.mxu2 %v1183_v32 }
 0x2cd   : > { %1606 = vmatmul.msk.f32.vlgmr.msrb.gmra.mxu3 %vm649_vm2, %v924_v61 }
 0x2ce   : > { %1205 = vmatpush.msra.mxu2 %v1182_v39 }
 0x2cf   : > { %v1766_v63 = vpop.eup %1765 }
 0x2d0   : > { %v927_v0 = vmul.f32 %v1766_v63, %v1752_v37  ;;  %1206 = vmatpush.msra.mxu2 %v1181_v40  ;;  %v1313_v63 = vld [vmem:[%s2199_s0 + $0x20] sm:$0xff] }
 0x2d2   : > { %1609 = vmatmul.msk.f32.vlgmr.msrb.gmra.mxu2 %vm649_vm2, %v927_v0 }
 0x2d3   : > { %v910_v1 = vpop.xlane.xlu1 %909 }
 0x2d4   : > { %1767 = vrcp.f32 %v910_v1  ;;  %v1312_v1 = vld [vmem:[%s2199_s0 + $0x18] sm:$0xff] }
 0x2d5   : > { %1769 = vrcp.f32 %v901_v62 }
 0x2da   : > { %v1768_v2 = vpop.eup %1767 }
 0x2db   : > { %v928_v3 = vmul.f32 %v1768_v2, %v1756_v45  ;;  %v1770_v4 = vpop.eup %1769  ;;  %v640_v7 = vpop.permute.xlu0 %639  ;;  %v1316_v45 = vld [vmem:[%s2199_s0 + $0x38] sm:$0xff] }
 0x2dc   : > { %v925_v5 = vmul.f32 %v1770_v4, %v1754_v38  ;;  %1332 = vmatpush.msrb.mxu3 %v1316_v45  ;;  %v1311_v4 = vld [vmem:[%s2199_s0 + $0x10] sm:$0xff] }
 0x2dd   : > { %1610 = vmatmul.msk.f32.vlgmr.msra.gmra.mxu3 %vm649_vm2, %v928_v3 }
 0x2de   : > { %1333 = vmatpush.msrb.mxu3 %v1315_v47 }
 0x2e0   : > { %1334 = vmatpush.msrb.mxu3 %v1314_v60 }
 0x2e2   : > { %1335 = vmatpush.msrb.mxu3 %v1313_v63 }
 0x2e4   : > { %1336 = vmatpush.msrb.mxu3 %v1312_v1 }
 0x2e6   : > { %1337 = vmatpush.msrb.mxu3 %v1311_v4 }
 0x2eb   : > { %v628_v6 = vpop.permute.xlu1 %627 }
 0x2ec   : > { %1017 = vmatpush.msra.mxu0 %v628_v6  ;;  %v1310_v6 = vld [vmem:[%s2199_s0 + $0x8] sm:$0xff] }
 0x2ed   : > { %1607 = vmatmul.msk.f32.vlgmr.msra.gmra.mxu0 %vm649_vm2, %v925_v5  ;;  %1338 = vmatpush.msrb.mxu3 %v1310_v6 }
 0x2ee   : > { %1109 = vmatpush.msrb.mxu0 %v640_v7 }
 0x301   : > { %v913_v8 = vpop.xlane.xlu2 %912 }
 0x302   : > { %1771 = vrcp.f32 %v913_v8 }
 0x303   : > { %1773 = vrcp.f32 %v2002_v48 }
 0x308   : > { %v1772_v9 = vpop.eup %1771 }
 0x309   : > { %v929_v12 = vmul.f32 %v1772_v9, %v1758_v52  ;;  %v1774_v49 = vpop.eup %1773  ;;  %v1309_v9 = vld [vmem:[%s2199_s0] sm:$0xff] }
 0x30a   : > { %vm1221_vm6 = vweird.f32 %v1774_v49  ;;  %1339 = vmatpush.msrb.mxu3 %v1309_v9 }
 0x30b   : > { %1611 = vmatmul.msk.f32.vlgmr.msrb.gmra.mxu0 %vm649_vm2, %v929_v12 }
 0x316   : > { %v973_v16 = vpop.f32.mrf.mxu2 }
 0x342   : > { %v1042_v14 = vpop.f32.mrf.mxu1 }
 0x343   : > { %1124 = vrot.lane.b32.xlu0 %v1042_v14, %s1999_s22 }
 0x350   : > { %v996_v15 = vpop.f32.mrf.mxu3 }
 0x351   : > { %1116 = vrot.lane.b32.xlu1 %v996_v15, %s2000_s19 }
 0x355   : > { %v1065_v18 = vpop.f32.mrf.mxu2 }
 0x360   : > { %v1088_v17 = vpop.f32.mrf.mxu3 }
 0x361   : > { %1132 = vrot.lane.b32.xlu1 %v1088_v17, %s2001_s16 }
 0x369   : > { %1126 = vrot.lane.b32.xlu1 %v1065_v18, %s1999_s22 }
 0x36a   : > { %v1019_v19 = vpop.f32.mrf.mxu0 }
 0x36b   : > { %1118 = vrot.lane.b32.xlu0 %v1019_v19, %s2000_s19 }
 0x388   : > { %v1111_v20 = vpop.f32.mrf.mxu0 }
 0x389   : > { %1134 = vrot.lane.b32.xlu0 %v1111_v20, %s2001_s16 }
 0x3b5   : > { %v1125_v27 = vpop.permute.xlu0 %1124 }
 0x3c3   : > { %v1117_v25 = vpop.permute.xlu1 %1116 }
 0x3c4   : > { %v1138_v26 = vsel %vm649_vm2, %v950_v13, %v1117_v25 }
 0x3c5   : > { %v1141_v28 = vsel %vm1140_vm4, %v1138_v26, %v1125_v27 }
 0x3d3   : > { %v1133_v29 = vpop.permute.xlu1 %1132 }
 0x3d4   : > { %v1144_v30 = vsel %vm1143_vm5, %v1141_v28, %v1133_v29 }
 0x3d5   : > { %1612 = vmatmul.msk.f32.vlgmr.msra.gmra.mxu1 %vm509_vm1, %v1144_v30 }
 0x3db   : > { %v1127_v35 = vpop.permute.xlu1 %1126 }
 0x3dd   : > { %v1119_v33 = vpop.permute.xlu0 %1118 }
 0x3de   : > { %v1139_v34 = vsel %vm649_vm2, %v973_v16, %v1119_v33 }
 0x3df   : > { %v1142_v37 = vsel %vm1140_vm4, %v1139_v34, %v1127_v35 }
 0x3fb   : > { %v1135_v36 = vpop.permute.xlu0 %1134 }
 0x3fc   : > { %v1145_v38 = vsel %vm1143_vm5, %v1142_v37, %v1135_v36 }
 0x3fd   : > { %1613 = vmatmul.msk.f32.gmra.mxu1 %vm509_vm1, %v1145_v38 }
 0x452   : > { %v1173_v41 = vpop.f32.mrf.mxu1 }
 0x453   : > { %v2304_v42 = vadd.f32 %v1173_v41, %v2202_v10  ;;  %v1217_v10 = vmul.f32 1.4142135, %v1774_v49 }
 0x455   : > { %1614 = vmatmul.msk.f32.vlgmr.msra.gmra.mxu2 %vm509_vm1, %v2304_v42  ;;  %v1218_v50 = vsub.f32 1.0, %v1217_v10 }
 0x457   : > { %v1219_v51 = vmul.f32 %v1774_v49, %v1218_v50 }
 0x459   : > { %v1220_v52 = vadd.f32 %v1774_v49, %v1219_v51 }
 0x45b   : > { %v1222_v53 = vsel %vm1221_vm6, %v1774_v49, %v1220_v52 }
 0x47a   : > { %v1176_v43 = vpop.f32.mrf.mxu1 }
 0x47b   : > { %v2309_v44 = vadd.f32 %v1176_v43, %v2208_v11 }
 0x47d   : > { %1615 = vmatmul.msk.f32.gmra.mxu2 %vm509_vm1, %v2309_v44 }
 0x4d8   : > { %v1208_v11 = vpop.f32.mrf.mxu2 }
 0x4d9   : > { %v1223_v54 = vmul.f32 %v1222_v53, %v1208_v11  ;;  %v1214_v39 = vmul.f32 0.5, %v1208_v11 }
 0x4db   : > { %v1225_v55 = vmul.f32 %v1223_v54, %v1223_v54 }
 0x4dd   : > { %v1226_v56 = vmin.f32 %v1225_v55, 16.0 }
 0x4df   : > { %v1227_v57 = vmul.f32 2.1237322e-06, %v1226_v56  ;;  %v1238_v58 = vmul.f32 3.8918573e-05, %v1226_v56 }
 0x4e1   : > { %v1228_v46 = vadd.f32 0.00028619796, %v1227_v57  ;;  %v1239_v59 = vadd.f32 0.001143296, %v1238_v58 }
 0x4e3   : > { %v1229_v61 = vmul.f32 %v1228_v46, %v1226_v56  ;;  %v1240_v62 = vmul.f32 %v1239_v59, %v1226_v56 }
 0x4e5   : > { %v1241_v0 = vadd.f32 0.014752088, %v1240_v62  ;;  %v1230_v2 = vadd.f32 0.0036580483, %v1229_v61 }
 0x4e7   : > { %v1242_v3 = vmul.f32 %v1241_v0, %v1226_v56  ;;  %v1231_v7 = vmul.f32 %v1230_v2, %v1226_v56 }
 0x4e9   : > { %v1243_v5 = vadd.f32 0.112945676, %v1242_v3  ;;  %v1232_v13 = vadd.f32 0.05243302, %v1231_v7 }
 0x4eb   : > { %v1244_v8 = vmul.f32 %v1243_v5, %v1226_v56  ;;  %v1233_v16 = vmul.f32 %v1232_v13, %v1226_v56 }
 0x4ed   : > { %v1245_v12 = vadd.f32 0.4994258, %v1244_v8  ;;  %v1234_v17 = vadd.f32 0.18741608, %v1233_v16 }
 0x4ef   : > { %v1246_v14 = vmul.f32 %v1245_v12, %v1226_v56  ;;  %v1235_v19 = vmul.f32 %v1234_v17, %v1226_v56 }
 0x4f1   : > { %v1247_v15 = vadd.f32 1.0, %v1246_v14  ;;  %v1236_v23 = vadd.f32 1.1283791, %v1235_v19 }
 0x4f3   : > { %1775 = vrcp.f32 %v1247_v15  ;;  %v1259_v22 = vand.u32 2147483648, %v1247_v15  ;;  %v1257_v25 = vand.u32 2147483647, %v1247_v15  ;;  %vm1253_vm8 = vweird.f32 %v1247_v15 }
 0x4f4   : > { %v1237_v30 = vmul.f32 %v1236_v23, %v1223_v54 }
 0x4f5   : > { %v1260_v29 = vor.u32 1.1754944e-38, %v1259_v22  ;;  %vm1258_vm10 = vcmp.eq.f32.partialorder %v1257_v25, 8.507059e+37 }
 0x4f9   : > { %v1776_v18 = vpop.eup %1775 }
 0x4fa   : > { %v1249_v20 = vmul.f32 %v1776_v18, %v1247_v15  ;;  %vm1254_vm7 = vweird.f32 %v1776_v18 }
 0x4fb   : > { %vm1255_vm9 = vmor %vm1253_vm8, %vm1254_vm7 }
 0x4fc   : > { %v1250_v21 = vsub.f32 1.0, %v1249_v20 }
 0x4fe   : > { %v1251_v24 = vmul.f32 %v1776_v18, %v1250_v21 }
 0x500   : > { %v1211_v26 = vpop.f32.mrf.mxu2  ;;  %v1252_v27 = vadd.f32 %v1776_v18, %v1251_v24 }
 0x501   : > { %v1224_v28 = vmul.f32 %v1222_v53, %v1211_v26  ;;  %v1215_v9 = vmul.f32 0.5, %v1211_v26 }
 0x502   : > { %v1256_v31 = vsel %vm1255_vm9, %v1776_v18, %v1252_v27 }
 0x503   : > { %v1261_v32 = vsel %vm1258_vm10, %v1260_v29, %v1256_v31  ;;  %v1265_v33 = vmul.f32 %v1224_v28, %v1224_v28 }
 0x504   : > { %v1262_v34 = vmul.f32 %v1261_v32, %v1237_v30 }
 0x505   : > { %v1266_v35 = vmin.f32 %v1265_v33, 16.0 }
 0x506   : > { %v1616_v36 = vclamps-f32 %v1262_v34, 1.0 }
 0x507   : > { %v1267_v37 = vmul.f32 2.1237322e-06, %v1266_v35  ;;  %v1278_v38 = vmul.f32 3.8918573e-05, %v1266_v35 }
 0x508   : > { %v1305_v40 = vadd.f32 1.0, %v1616_v36 }
 0x509   : > { %v1268_v41 = vadd.f32 0.00028619796, %v1267_v37  ;;  %v1279_v43 = vadd.f32 0.001143296, %v1278_v38 }
 0x50a   : > { %v1307_v45 = vmul.f32 %v1305_v40, %v1214_v39 }
 0x50b   : > { %v1269_v47 = vmul.f32 %v1268_v41, %v1266_v35  ;;  %v1280_v48 = vmul.f32 %v1279_v43, %v1266_v35 }
 0x50c   : > { %1618 = vmatmul.msk.f32.vlgmr.msrb.gmra.mxu3 %vm1317_vm11, %v1307_v45 }
 0x50d   : > { %v1281_v49 = vadd.f32 0.014752088, %v1280_v48  ;;  %v1270_v10 = vadd.f32 0.0036580483, %v1269_v47 }
 0x50f   : > { %v1282_v50 = vmul.f32 %v1281_v49, %v1266_v35  ;;  %v1271_v52 = vmul.f32 %v1270_v10, %v1266_v35 }
 0x511   : > { %v1283_v51 = vadd.f32 0.112945676, %v1282_v50  ;;  %v1272_v55 = vadd.f32 0.05243302, %v1271_v52 }
 0x513   : > { %v1284_v53 = vmul.f32 %v1283_v51, %v1266_v35  ;;  %v1273_v11 = vmul.f32 %v1272_v55, %v1266_v35 }
 0x515   : > { %v1285_v54 = vadd.f32 0.4994258, %v1284_v53  ;;  %v1274_v58 = vadd.f32 0.18741608, %v1273_v11 }
 0x517   : > { %v1286_v56 = vmul.f32 %v1285_v54, %v1266_v35  ;;  %v1275_v59 = vmul.f32 %v1274_v58, %v1266_v35 }
 0x519   : > { %v1287_v57 = vadd.f32 1.0, %v1286_v56  ;;  %v1276_v63 = vadd.f32 1.1283791, %v1275_v59 }
 0x51b   : > { %1777 = vrcp.f32 %v1287_v57  ;;  %v1299_v62 = vand.u32 2147483648, %v1287_v57  ;;  %v1297_v1 = vand.u32 2147483647, %v1287_v57  ;;  %vm1293_vm13 = vweird.f32 %v1287_v57 }
 0x51c   : > { %v1277_v4 = vmul.f32 %v1276_v63, %v1224_v28 }
 0x51d   : > { %v1300_v3 = vor.u32 1.1754944e-38, %v1299_v62  ;;  %vm1298_vm15 = vcmp.eq.f32.partialorder %v1297_v1, 8.507059e+37 }
 0x521   : > { %v1778_v46 = vpop.eup %1777 }
 0x522   : > { %v1289_v60 = vmul.f32 %v1778_v46, %v1287_v57  ;;  %vm1294_vm12 = vweird.f32 %v1778_v46 }
 0x523   : > { %vm1295_vm14 = vmor %vm1293_vm13, %vm1294_vm12 }
 0x524   : > { %v1290_v61 = vsub.f32 1.0, %v1289_v60 }
 0x526   : > { %v1291_v0 = vmul.f32 %v1778_v46, %v1290_v61 }
 0x528   : > { %v1292_v2 = vadd.f32 %v1778_v46, %v1291_v0 }
 0x52a   : > { %v1296_v5 = vsel %vm1295_vm14, %v1778_v46, %v1292_v2 }
 0x52b   : > { %v1301_v6 = vsel %vm1298_vm15, %v1300_v3, %v1296_v5 }
 0x52c   : > { %v1302_v7 = vmul.f32 %v1301_v6, %v1277_v4 }
 0x52e   : > { %v1617_v8 = vclamps-f32 %v1302_v7, 1.0 }
 0x530   : > { %v1306_v12 = vadd.f32 1.0, %v1617_v8 }
 0x532   : > { %v1308_v13 = vmul.f32 %v1306_v12, %v1215_v9 }
 0x534   : > { %1619 = vmatmul.msk.f32.gmra.mxu3 %vm1317_vm11, %v1308_v13 }
 0x58f   : > { %v1341_v14 = vpop.f32.mrf.mxu3 }
 0x590   : > { %v1347_v15 = vadd.f32 %v1341_v14, %v2304_v42 }
 0x592   : > { %1349 = vst.msk [vmem:[#allocation2] sm:$0xff] %vm509_vm1, %v1347_v15 }
 0x5b6   : > { %1354 = sbr.rel (%p1620_p3) target bundleno = 1603 (0x643), region = 76 }
 0x5b7   : > { %v1344_v16 = vpop.f32.mrf.mxu3 }
 0x5b8   : > { %v1348_v17 = vadd.f32 %v1344_v16, %v2309_v44 }
 0x5ba   : > { %1350 = vst.msk [vmem:[#allocation2 + $0x8] sm:$0xff] %vm509_vm1, %v1348_v17 }
 0x5bb   : > { %v1358_v18 = vld [vmem:[#allocation9 + $0x18] sm:$0xff]  ;;  %v1357_v19 = vld [vmem:[#allocation9 + $0x10] sm:$0xff]  ;;  %v1356_v20 = vld [vmem:[#allocation9 + $0x8] sm:$0xff] }
 0x5bc   : > { %1377 = vmatpush.msra.mxu0 %v1358_v18  ;;  %1633 = vmatpush.msra.mxu1 %v1358_v18  ;;  %v1355_v21 = vld [vmem:[#allocation9] sm:$0xff] }
 0x5be   : > { %1378 = vmatpush.msra.mxu0 %v1357_v19  ;;  %1634 = vmatpush.msra.mxu1 %v1357_v19 }
 0x5c0   : > { %1379 = vmatpush.msra.mxu0 %v1356_v20  ;;  %1635 = vmatpush.msra.mxu1 %v1356_v20 }
 0x5c2   : > { %1380 = vmatpush.msra.mxu0 %v1355_v21  ;;  %1636 = vmatpush.msra.mxu1 %v1355_v21 }
 0x5c3   : > { %1621 = vmatmul.msk.f32.vlgmr.msra.gmra.mxu0 %vm509_vm1, %v1347_v15  ;;  %1622 = vmatmul.msk.f32.vlgmr.msra.gmra.mxu1 %vm509_vm1, %v1348_v17 }
 0x640   : > { %v1382_v42 = vpop.f32.mrf.mxu0  ;;  %v1385_v44 = vpop.f32.mrf.mxu1 }
 0x641   : > { %1388 = vst.msk [vmem:[#allocation11] sm:$0xff] %vm1317_vm11, %v1382_v42 }
 0x642   : > { %1389 = vst.msk [vmem:[#allocation11 + $0x8] sm:$0xff] %vm1317_vm11, %v1385_v44 }
 0x643 PF: > { %p1672_p4 = scmp.eq.s32.totalorder %s2123_s11, 1  ;;  %s1400_s14 = sshll.u32 %s2363_s8, 4  ;;  %s1401_s14 = int_to_ptr.hbm [resolvable:$true] %s1400_s14 }
 0x644   : > { %s2003_s4 = smov [#allocation11]   ;;  %s2004_s13 = smov 128  }
 0x645   : > { %s1398_s15 = sshll.u32 %s2003_s4, 4  ;;  %s1399_s15 = int_to_ptr.vmem [resolvable:$true] %s1398_s15 }
 0x646   : > { %1650 = dma.vmem_to_hbm [thread:$0]  (%p1672_p4), %s1399_s15, 256, %s1401_s14, [#allocation5], %s2004_s13, %s2004_s13, %s2000_s19  }
 0x647   : > { %1964 = dma.done.wait (%p1672_p4), [#allocation5], 256  }
 0x648   : > { %1966 = vsyncadd (%p1672_p4), [#allocation5], 4294967040 }
 0x649 PF: > { %s24_s10 = sadd.s32 1, %s1989_s10   ;;  %s2374_s11 = sld [smem:[#allocation16_spill]] }
 0x64a   : > { %p21_p5 = scmp.ge.s32.totalorder %s24_s10, 4   ;;  %s2375_s27 = smov %s1973_s28 }
 0x64b   : > { %s2376_s28 = smov %s1977_s29  ;;  %s2377_s29 = smov %s2097_s17 }
 0x64c   : > { %s2378_s30 = smov %s1985_s9  ;;  %23 = sbr.rel (!%p21_p5) target bundleno = 10 (0xa), region = 131 }
 0x64f   : > { %s2379_s9 = smov %s2374_s11 }
 0x651   :  { %1417 = vsyncpa [#allocation4], 1 }
 0x652   :  { %1419 = vsyncpa [#allocation4 + $0x1], 1 }
 0x653   :  { %1420 = vsyncpa [#allocation7], 1 }
 0x654   :  { %1422 = vsyncpa [#allocation7 + $0x1], 1 }
 0x655   :  { %1423 = vsyncpa [#allocation10], 1 }
 0x656   :  { %1424 = vsyncpa [#allocation5], 1 }
 0x657   :  { %1426 = vsyncpa [#allocation5 + $0x1], 1 }

</bundles_post_ra>
